<compile_context>
chip_gen: v5e
topology: v5e:2x2
jax: 0.10.0
libtpu: 0.0.40
codegen_flags: <defaults>
</compile_context>

<pallas_src>
import functools

import jax
import jax.numpy as jnp
from jax.experimental import pallas as pl
from jax.experimental.pallas import tpu as pltpu


# --------------------------- fused kernel -----------------------------------
def _fused_region_attn_kernel(x_ref, x2_ref, wqkv_ref, bqkv_ref, wproj_ref,
                              bproj_ref, o_ref, head_buf, *, num_heads, scale):
    N, C = x_ref.shape
    hd = C // num_heads

    x = x_ref[...]                 # (N, C)
    bias = x2_ref[...]             # (N, N) region bias, shared by all heads

    # qkv projection: (N, C) @ (C, 3C) -> (N, 3C); 3C axis is laid out [3, H, hd]
    qkv = (jnp.dot(x, wqkv_ref[...], preferred_element_type=jnp.float32)
           + bqkv_ref[...])

    # Unrolled static loop over heads; tiny per-head matmuls stay in vregs.
    for h in range(num_heads):
        lo = h * hd
        qh = qkv[:, lo:lo + hd]                      # (N, hd)
        kh = qkv[:, C + lo:C + lo + hd]              # (N, hd)
        vh = qkv[:, 2 * C + lo:2 * C + lo + hd]      # (N, hd)

        # scores = q @ k^T * scale
        s = pl.dot(qh, kh, trans_b=True) * scale     # (N, N) f32

        # softmax over last axis (EUP exp + approx reciprocal)
        s = s - jnp.max(s, axis=-1, keepdims=True)
        p = jnp.exp(s)
        p = p * pl.reciprocal(jnp.sum(p, axis=-1, keepdims=True), approx=True)

        # post-softmax region bias (matches torch: attn = attn + x2)
        p = p + bias

        # merged-head output slice (this is the (attn @ v).transpose/reshape)
        head_buf[:, lo:lo + hd] = jnp.dot(p, vh,
                                          preferred_element_type=jnp.float32)

    # output projection on merged heads: (N, C) @ (C, C) + b
    y = (jnp.dot(head_buf[...], wproj_ref[...],
                 preferred_element_type=jnp.float32) + bproj_ref[...])
    o_ref[...] = y.astype(o_ref.dtype)


# ------------------------------- wrapper ------------------------------------
def region_attention(x, x2, params, num_heads):
    B, N, C = x.shape
    hd = C // num_heads
    scale = hd ** (-0.5)

    kernel = functools.partial(_fused_region_attn_kernel,
                               num_heads=num_heads, scale=scale)

    flops = B * (2 * N * C * (3 * C)            # qkv projection
                 + num_heads * 4 * N * N * hd   # q k^T and attn @ v
                 + 2 * N * C * C)               # output projection
    transcendentals = B * num_heads * N * N     # exp
    bytes_accessed = 4 * (2 * B * N * C + B * N * N
                          + C * 3 * C + 3 * C + C * C + C)

    # TODO(synk): if N ever scales to thousands, tile the (N,N) bias/scores
    # over the KV axis (out = softmax(s)@v + bias@v) instead of whole-row tiles.
    return pl.pallas_call(
        kernel,
        out_shape=jax.ShapeDtypeStruct((B, N, C), x.dtype),
        grid_spec=pltpu.PrefetchScalarGridSpec(
            num_scalar_prefetch=0,
            grid=(B,),
            in_specs=[
                pl.BlockSpec((None, N, C), lambda b: (b, 0, 0)),   # x
                pl.BlockSpec((None, N, N), lambda b: (b, 0, 0)),   # x2 (region bias)
                pl.BlockSpec((C, 3 * C), lambda b: (0, 0)),        # w_qkv (resident)
                pl.BlockSpec((1, 3 * C), lambda b: (0, 0)),        # b_qkv (resident)
                pl.BlockSpec((C, C), lambda b: (0, 0)),            # w_proj (resident)
                pl.BlockSpec((1, C), lambda b: (0, 0)),            # b_proj (resident)
            ],
            out_specs=pl.BlockSpec((None, N, C), lambda b: (b, 0, 0)),
            scratch_shapes=[pltpu.VMEM((N, C), jnp.float32)],      # merged heads
        ),
        compiler_params=pltpu.CompilerParams(
            dimension_semantics=("parallel",)),                    # v7x: 2 TCs
        cost_estimate=pl.CostEstimate(flops=flops,
                                      transcendentals=transcendentals,
                                      bytes_accessed=bytes_accessed),
    )(x, x2, params["w_qkv"], params["b_qkv"],
      params["w_proj"], params["b_proj"])


# ------------------------------ reference -----------------------------------
def region_attention_ref(x, x2, params, num_heads):
    B, N, C = x.shape
    hd = C // num_heads
    scale = hd ** (-0.5)
    qkv = (x.reshape(B * N, C) @ params["w_qkv"] + params["b_qkv"]).reshape(
        B, N, 3, num_heads, hd)
    qkv = jnp.transpose(qkv, (2, 0, 3, 1, 4))
    q, k, v = qkv[0], qkv[1], qkv[2]
    attn = jnp.einsum("bhnd,bhmd->bhnm", q, k) * scale
    attn = jax.nn.softmax(attn, axis=-1)
    attn = attn + x2[:, None, :, :]
    o = jnp.einsum("bhnm,bhmd->bhnd", attn, v)
    o = jnp.transpose(o, (0, 2, 1, 3)).reshape(B, N, C)
    return (o.reshape(B * N, C) @ params["w_proj"] + params["b_proj"]).reshape(B, N, C)


if __name__ == "__main__":
    B, N, C, H = 2, 16, 48, 6   # head_dim = 8, matches default num_heads=6

    key = jax.random.PRNGKey(0)
    ks = jax.random.split(key, 5)
    x = jax.random.normal(ks[0], (B, N, C), jnp.float32)
    x2 = jax.random.normal(ks[1], (B, N, N), jnp.float32) * 0.1

    params = {
        # stored as (in, out); qkv_bias=False -> zero bias (equivalent)
        "w_qkv": jax.random.normal(ks[2], (C, 3 * C), jnp.float32) * 0.05,
        "b_qkv": jnp.zeros((1, 3 * C), jnp.float32),
        "w_proj": jax.random.normal(ks[3], (C, C), jnp.float32) * 0.05,
        "b_proj": jax.random.normal(ks[4], (1, C), jnp.float32) * 0.05,
    }

    y = region_attention(x, x2, params, H)
    jax.block_until_ready(y)

    y_ref = region_attention_ref(x, x2, params, H)
    err = float(jnp.max(jnp.abs(y - y_ref)))
    # tolerance relaxed slightly vs pure-f32 because the softmax denominator
    # uses the EUP approximate reciprocal (pl.reciprocal(..., approx=True)).
    assert jnp.allclose(y, y_ref, atol=2e-3, rtol=2e-3), f"max abs err {err}"
    print("KERNEL_OK")
</pallas_src>

<mosaic_0001>
module attributes {stable_mosaic.version = 11 : i64} {
  func.func @_fused_region_attn_kernel(%arg0: i32, %arg1: memref<1x16x48xf32, #tpu.memory_space<vmem>>, %arg2: memref<1x16x16xf32, #tpu.memory_space<vmem>>, %arg3: memref<48x144xf32, #tpu.memory_space<vmem>>, %arg4: memref<1x144xf32, #tpu.memory_space<vmem>>, %arg5: memref<48x48xf32, #tpu.memory_space<vmem>>, %arg6: memref<1x48xf32, #tpu.memory_space<vmem>>, %arg7: memref<1x16x48xf32, #tpu.memory_space<vmem>>, %arg8: memref<16x48xf32, #tpu.memory_space<vmem>>) attributes {dimension_semantics = [#tpu.dimension_semantics<parallel>], iteration_bounds = array<i64: 2>, scalar_prefetch = 0 : i64, scratch_operands = 1 : i64, tpu.core_type = #tpu.core_type<tc>, window_params = [{transform_indices = @transform_0, window_bounds = array<i64: 1, 16, 48>}, {transform_indices = @transform_1, window_bounds = array<i64: 1, 16, 16>}, {pipeline_mode = #tpu.pipeline_mode<synchronous>, transform_indices = @transform_2, window_bounds = array<i64: 48, 144>}, {pipeline_mode = #tpu.pipeline_mode<synchronous>, transform_indices = @transform_3, window_bounds = array<i64: 1, 144>}, {pipeline_mode = #tpu.pipeline_mode<synchronous>, transform_indices = @transform_4, window_bounds = array<i64: 48, 48>}, {pipeline_mode = #tpu.pipeline_mode<synchronous>, transform_indices = @transform_5, window_bounds = array<i64: 1, 48>}, {transform_indices = @transform_6, window_bounds = array<i64: 1, 16, 48>}]} {
    %c0 = arith.constant 0 : index
    %c0_0 = arith.constant 0 : index
    %c0_1 = arith.constant 0 : index
    %0 = vector.load %arg1[%c0, %c0_0, %c0_1] : memref<1x16x48xf32, #tpu.memory_space<vmem>>, vector<1x16x48xf32>
    %1 = vector.shape_cast %0 : vector<1x16x48xf32> to vector<16x48xf32>
    %c0_2 = arith.constant 0 : index
    %c0_3 = arith.constant 0 : index
    %c0_4 = arith.constant 0 : index
    %2 = vector.load %arg2[%c0_2, %c0_3, %c0_4] : memref<1x16x16xf32, #tpu.memory_space<vmem>>, vector<1x16x16xf32>
    %3 = vector.shape_cast %2 : vector<1x16x16xf32> to vector<16x16xf32>
    %c0_5 = arith.constant 0 : index
    %c0_6 = arith.constant 0 : index
    %4 = vector.load %arg3[%c0_5, %c0_6] : memref<48x144xf32, #tpu.memory_space<vmem>>, vector<48x144xf32>
    %cst = arith.constant dense<0.000000e+00> : vector<16x144xf32>
    %5 = tpu.matmul %1, %4, %cst {dimension_numbers = #tpu.dot_dimension_numbers<[1], [0], [0], [1], [0, 0, 1, 1], [], []>} : vector<16x48xf32>, vector<48x144xf32>, vector<16x144xf32> -> vector<16x144xf32>
    %c0_7 = arith.constant 0 : index
    %c0_8 = arith.constant 0 : index
    %6 = vector.load %arg4[%c0_7, %c0_8] : memref<1x144xf32, #tpu.memory_space<vmem>>, vector<1x144xf32>
    %7 = vector.broadcast %6 : vector<1x144xf32> to vector<16x144xf32>
    %8 = arith.addf %5, %7 : vector<16x144xf32>
    %9 = vector.extract_strided_slice %8 {offsets = [0, 0], sizes = [16, 8], strides = [1, 1]} : vector<16x144xf32> to vector<16x8xf32>
    %10 = vector.extract_strided_slice %8 {offsets = [0, 48], sizes = [16, 8], strides = [1, 1]} : vector<16x144xf32> to vector<16x8xf32>
    %11 = vector.extract_strided_slice %8 {offsets = [0, 96], sizes = [16, 8], strides = [1, 1]} : vector<16x144xf32> to vector<16x8xf32>
    %cst_9 = arith.constant dense<0.000000e+00> : vector<16x16xf32>
    %12 = tpu.matmul %9, %10, %cst_9 {dimension_numbers = #tpu.dot_dimension_numbers<[1], [1], [0], [0], [0, 0, 1, 0], [], []>} : vector<16x8xf32>, vector<16x8xf32>, vector<16x16xf32> -> vector<16x16xf32>
    %cst_10 = arith.constant 0.353553385 : f32
    %13 = vector.broadcast %cst_10 : f32 to vector<16x16xf32>
    %14 = arith.mulf %12, %13 : vector<16x16xf32>
    %cst_11 = arith.constant dense<0xFF800000> : vector<16xf32>
    %15 = vector.multi_reduction <maximumf>, %14, %cst_11 [1] : vector<16x16xf32> to vector<16xf32>
    %16 = vector.shape_cast %15 : vector<16xf32> to vector<16x1xf32>
    %17 = vector.broadcast %16 : vector<16x1xf32> to vector<16x16xf32>
    %18 = arith.subf %14, %17 : vector<16x16xf32>
    %19 = math.exp %18 : vector<16x16xf32>
    %cst_12 = arith.constant dense<0.000000e+00> : vector<16xf32>
    %20 = vector.multi_reduction <add>, %19, %cst_12 [1] : vector<16x16xf32> to vector<16xf32>
    %21 = vector.shape_cast %20 : vector<16xf32> to vector<16x1xf32>
    %22 = tpu.reciprocal %21 {approx = true} : vector<16x1xf32> -> vector<16x1xf32>
    %23 = vector.broadcast %22 : vector<16x1xf32> to vector<16x16xf32>
    %24 = arith.mulf %19, %23 : vector<16x16xf32>
    %25 = arith.addf %24, %3 : vector<16x16xf32>
    %cst_13 = arith.constant dense<0.000000e+00> : vector<16x8xf32>
    %26 = tpu.matmul %25, %11, %cst_13 {dimension_numbers = #tpu.dot_dimension_numbers<[1], [0], [0], [1], [0, 0, 1, 1], [], []>} : vector<16x16xf32>, vector<16x8xf32>, vector<16x8xf32> -> vector<16x8xf32>
    %c0_14 = arith.constant 0 : index
    %c0_15 = arith.constant 0 : index
    %27 = vector.load %arg8[%c0_14, %c0_15] : memref<16x48xf32, #tpu.memory_space<vmem>>, vector<16x8xf32>
    tpu.vector_store %arg8[%c0_14, %c0_15], %26 {strides = array<i32>} : memref<16x48xf32, #tpu.memory_space<vmem>>, vector<16x8xf32>,
    %28 = vector.extract_strided_slice %8 {offsets = [0, 8], sizes = [16, 8], strides = [1, 1]} : vector<16x144xf32> to vector<16x8xf32>
    %29 = vector.extract_strided_slice %8 {offsets = [0, 56], sizes = [16, 8], strides = [1, 1]} : vector<16x144xf32> to vector<16x8xf32>
    %30 = vector.extract_strided_slice %8 {offsets = [0, 104], sizes = [16, 8], strides = [1, 1]} : vector<16x144xf32> to vector<16x8xf32>
    %cst_16 = arith.constant dense<0.000000e+00> : vector<16x16xf32>
    %31 = tpu.matmul %28, %29, %cst_16 {dimension_numbers = #tpu.dot_dimension_numbers<[1], [1], [0], [0], [0, 0, 1, 0], [], []>} : vector<16x8xf32>, vector<16x8xf32>, vector<16x16xf32> -> vector<16x16xf32>
    %cst_17 = arith.constant 0.353553385 : f32
    %32 = vector.broadcast %cst_17 : f32 to vector<16x16xf32>
    %33 = arith.mulf %31, %32 : vector<16x16xf32>
    %cst_18 = arith.constant dense<0xFF800000> : vector<16xf32>
    %34 = vector.multi_reduction <maximumf>, %33, %cst_18 [1] : vector<16x16xf32> to vector<16xf32>
    %35 = vector.shape_cast %34 : vector<16xf32> to vector<16x1xf32>
    %36 = vector.broadcast %35 : vector<16x1xf32> to vector<16x16xf32>
    %37 = arith.subf %33, %36 : vector<16x16xf32>
    %38 = math.exp %37 : vector<16x16xf32>
    %cst_19 = arith.constant dense<0.000000e+00> : vector<16xf32>
    %39 = vector.multi_reduction <add>, %38, %cst_19 [1] : vector<16x16xf32> to vector<16xf32>
    %40 = vector.shape_cast %39 : vector<16xf32> to vector<16x1xf32>
    %41 = tpu.reciprocal %40 {approx = true} : vector<16x1xf32> -> vector<16x1xf32>
    %42 = vector.broadcast %41 : vector<16x1xf32> to vector<16x16xf32>
    %43 = arith.mulf %38, %42 : vector<16x16xf32>
    %44 = arith.addf %43, %3 : vector<16x16xf32>
    %cst_20 = arith.constant dense<0.000000e+00> : vector<16x8xf32>
    %45 = tpu.matmul %44, %30, %cst_20 {dimension_numbers = #tpu.dot_dimension_numbers<[1], [0], [0], [1], [0, 0, 1, 1], [], []>} : vector<16x16xf32>, vector<16x8xf32>, vector<16x8xf32> -> vector<16x8xf32>
    %c0_21 = arith.constant 0 : index
    %c8 = arith.constant 8 : index
    %46 = vector.load %arg8[%c0_21, %c8] : memref<16x48xf32, #tpu.memory_space<vmem>>, vector<16x8xf32>
    tpu.vector_store %arg8[%c0_21, %c8], %45 {strides = array<i32>} : memref<16x48xf32, #tpu.memory_space<vmem>>, vector<16x8xf32>,
    %47 = vector.extract_strided_slice %8 {offsets = [0, 16], sizes = [16, 8], strides = [1, 1]} : vector<16x144xf32> to vector<16x8xf32>
    %48 = vector.extract_strided_slice %8 {offsets = [0, 64], sizes = [16, 8], strides = [1, 1]} : vector<16x144xf32> to vector<16x8xf32>
    %49 = vector.extract_strided_slice %8 {offsets = [0, 112], sizes = [16, 8], strides = [1, 1]} : vector<16x144xf32> to vector<16x8xf32>
    %cst_22 = arith.constant dense<0.000000e+00> : vector<16x16xf32>
    %50 = tpu.matmul %47, %48, %cst_22 {dimension_numbers = #tpu.dot_dimension_numbers<[1], [1], [0], [0], [0, 0, 1, 0], [], []>} : vector<16x8xf32>, vector<16x8xf32>, vector<16x16xf32> -> vector<16x16xf32>
    %cst_23 = arith.constant 0.353553385 : f32
    %51 = vector.broadcast %cst_23 : f32 to vector<16x16xf32>
    %52 = arith.mulf %50, %51 : vector<16x16xf32>
    %cst_24 = arith.constant dense<0xFF800000> : vector<16xf32>
    %53 = vector.multi_reduction <maximumf>, %52, %cst_24 [1] : vector<16x16xf32> to vector<16xf32>
    %54 = vector.shape_cast %53 : vector<16xf32> to vector<16x1xf32>
    %55 = vector.broadcast %54 : vector<16x1xf32> to vector<16x16xf32>
    %56 = arith.subf %52, %55 : vector<16x16xf32>
    %57 = math.exp %56 : vector<16x16xf32>
    %cst_25 = arith.constant dense<0.000000e+00> : vector<16xf32>
    %58 = vector.multi_reduction <add>, %57, %cst_25 [1] : vector<16x16xf32> to vector<16xf32>
    %59 = vector.shape_cast %58 : vector<16xf32> to vector<16x1xf32>
    %60 = tpu.reciprocal %59 {approx = true} : vector<16x1xf32> -> vector<16x1xf32>
    %61 = vector.broadcast %60 : vector<16x1xf32> to vector<16x16xf32>
    %62 = arith.mulf %57, %61 : vector<16x16xf32>
    %63 = arith.addf %62, %3 : vector<16x16xf32>
    %cst_26 = arith.constant dense<0.000000e+00> : vector<16x8xf32>
    %64 = tpu.matmul %63, %49, %cst_26 {dimension_numbers = #tpu.dot_dimension_numbers<[1], [0], [0], [1], [0, 0, 1, 1], [], []>} : vector<16x16xf32>, vector<16x8xf32>, vector<16x8xf32> -> vector<16x8xf32>
    %c0_27 = arith.constant 0 : index
    %c16 = arith.constant 16 : index
    %65 = vector.load %arg8[%c0_27, %c16] : memref<16x48xf32, #tpu.memory_space<vmem>>, vector<16x8xf32>
    tpu.vector_store %arg8[%c0_27, %c16], %64 {strides = array<i32>} : memref<16x48xf32, #tpu.memory_space<vmem>>, vector<16x8xf32>,
    %66 = vector.extract_strided_slice %8 {offsets = [0, 24], sizes = [16, 8], strides = [1, 1]} : vector<16x144xf32> to vector<16x8xf32>
    %67 = vector.extract_strided_slice %8 {offsets = [0, 72], sizes = [16, 8], strides = [1, 1]} : vector<16x144xf32> to vector<16x8xf32>
    %68 = vector.extract_strided_slice %8 {offsets = [0, 120], sizes = [16, 8], strides = [1, 1]} : vector<16x144xf32> to vector<16x8xf32>
    %cst_28 = arith.constant dense<0.000000e+00> : vector<16x16xf32>
    %69 = tpu.matmul %66, %67, %cst_28 {dimension_numbers = #tpu.dot_dimension_numbers<[1], [1], [0], [0], [0, 0, 1, 0], [], []>} : vector<16x8xf32>, vector<16x8xf32>, vector<16x16xf32> -> vector<16x16xf32>
    %cst_29 = arith.constant 0.353553385 : f32
    %70 = vector.broadcast %cst_29 : f32 to vector<16x16xf32>
    %71 = arith.mulf %69, %70 : vector<16x16xf32>
    %cst_30 = arith.constant dense<0xFF800000> : vector<16xf32>
    %72 = vector.multi_reduction <maximumf>, %71, %cst_30 [1] : vector<16x16xf32> to vector<16xf32>
    %73 = vector.shape_cast %72 : vector<16xf32> to vector<16x1xf32>
    %74 = vector.broadcast %73 : vector<16x1xf32> to vector<16x16xf32>
    %75 = arith.subf %71, %74 : vector<16x16xf32>
    %76 = math.exp %75 : vector<16x16xf32>
    %cst_31 = arith.constant dense<0.000000e+00> : vector<16xf32>
    %77 = vector.multi_reduction <add>, %76, %cst_31 [1] : vector<16x16xf32> to vector<16xf32>
    %78 = vector.shape_cast %77 : vector<16xf32> to vector<16x1xf32>
    %79 = tpu.reciprocal %78 {approx = true} : vector<16x1xf32> -> vector<16x1xf32>
    %80 = vector.broadcast %79 : vector<16x1xf32> to vector<16x16xf32>
    %81 = arith.mulf %76, %80 : vector<16x16xf32>
    %82 = arith.addf %81, %3 : vector<16x16xf32>
    %cst_32 = arith.constant dense<0.000000e+00> : vector<16x8xf32>
    %83 = tpu.matmul %82, %68, %cst_32 {dimension_numbers = #tpu.dot_dimension_numbers<[1], [0], [0], [1], [0, 0, 1, 1], [], []>} : vector<16x16xf32>, vector<16x8xf32>, vector<16x8xf32> -> vector<16x8xf32>
    %c0_33 = arith.constant 0 : index
    %c24 = arith.constant 24 : index
    %84 = vector.load %arg8[%c0_33, %c24] : memref<16x48xf32, #tpu.memory_space<vmem>>, vector<16x8xf32>
    tpu.vector_store %arg8[%c0_33, %c24], %83 {strides = array<i32>} : memref<16x48xf32, #tpu.memory_space<vmem>>, vector<16x8xf32>,
    %85 = vector.extract_strided_slice %8 {offsets = [0, 32], sizes = [16, 8], strides = [1, 1]} : vector<16x144xf32> to vector<16x8xf32>
    %86 = vector.extract_strided_slice %8 {offsets = [0, 80], sizes = [16, 8], strides = [1, 1]} : vector<16x144xf32> to vector<16x8xf32>
    %87 = vector.extract_strided_slice %8 {offsets = [0, 128], sizes = [16, 8], strides = [1, 1]} : vector<16x144xf32> to vector<16x8xf32>
    %cst_34 = arith.constant dense<0.000000e+00> : vector<16x16xf32>
    %88 = tpu.matmul %85, %86, %cst_34 {dimension_numbers = #tpu.dot_dimension_numbers<[1], [1], [0], [0], [0, 0, 1, 0], [], []>} : vector<16x8xf32>, vector<16x8xf32>, vector<16x16xf32> -> vector<16x16xf32>
    %cst_35 = arith.constant 0.353553385 : f32
    %89 = vector.broadcast %cst_35 : f32 to vector<16x16xf32>
    %90 = arith.mulf %88, %89 : vector<16x16xf32>
    %cst_36 = arith.constant dense<0xFF800000> : vector<16xf32>
    %91 = vector.multi_reduction <maximumf>, %90, %cst_36 [1] : vector<16x16xf32> to vector<16xf32>
    %92 = vector.shape_cast %91 : vector<16xf32> to vector<16x1xf32>
    %93 = vector.broadcast %92 : vector<16x1xf32> to vector<16x16xf32>
    %94 = arith.subf %90, %93 : vector<16x16xf32>
    %95 = math.exp %94 : vector<16x16xf32>
    %cst_37 = arith.constant dense<0.000000e+00> : vector<16xf32>
    %96 = vector.multi_reduction <add>, %95, %cst_37 [1] : vector<16x16xf32> to vector<16xf32>
    %97 = vector.shape_cast %96 : vector<16xf32> to vector<16x1xf32>
    %98 = tpu.reciprocal %97 {approx = true} : vector<16x1xf32> -> vector<16x1xf32>
    %99 = vector.broadcast %98 : vector<16x1xf32> to vector<16x16xf32>
    %100 = arith.mulf %95, %99 : vector<16x16xf32>
    %101 = arith.addf %100, %3 : vector<16x16xf32>
    %cst_38 = arith.constant dense<0.000000e+00> : vector<16x8xf32>
    %102 = tpu.matmul %101, %87, %cst_38 {dimension_numbers = #tpu.dot_dimension_numbers<[1], [0], [0], [1], [0, 0, 1, 1], [], []>} : vector<16x16xf32>, vector<16x8xf32>, vector<16x8xf32> -> vector<16x8xf32>
    %c0_39 = arith.constant 0 : index
    %c32 = arith.constant 32 : index
    %103 = vector.load %arg8[%c0_39, %c32] : memref<16x48xf32, #tpu.memory_space<vmem>>, vector<16x8xf32>
    tpu.vector_store %arg8[%c0_39, %c32], %102 {strides = array<i32>} : memref<16x48xf32, #tpu.memory_space<vmem>>, vector<16x8xf32>,
    %104 = vector.extract_strided_slice %8 {offsets = [0, 40], sizes = [16, 8], strides = [1, 1]} : vector<16x144xf32> to vector<16x8xf32>
    %105 = vector.extract_strided_slice %8 {offsets = [0, 88], sizes = [16, 8], strides = [1, 1]} : vector<16x144xf32> to vector<16x8xf32>
    %106 = vector.extract_strided_slice %8 {offsets = [0, 136], sizes = [16, 8], strides = [1, 1]} : vector<16x144xf32> to vector<16x8xf32>
    %cst_40 = arith.constant dense<0.000000e+00> : vector<16x16xf32>
    %107 = tpu.matmul %104, %105, %cst_40 {dimension_numbers = #tpu.dot_dimension_numbers<[1], [1], [0], [0], [0, 0, 1, 0], [], []>} : vector<16x8xf32>, vector<16x8xf32>, vector<16x16xf32> -> vector<16x16xf32>
    %cst_41 = arith.constant 0.353553385 : f32
    %108 = vector.broadcast %cst_41 : f32 to vector<16x16xf32>
    %109 = arith.mulf %107, %108 : vector<16x16xf32>
    %cst_42 = arith.constant dense<0xFF800000> : vector<16xf32>
    %110 = vector.multi_reduction <maximumf>, %109, %cst_42 [1] : vector<16x16xf32> to vector<16xf32>
    %111 = vector.shape_cast %110 : vector<16xf32> to vector<16x1xf32>
    %112 = vector.broadcast %111 : vector<16x1xf32> to vector<16x16xf32>
    %113 = arith.subf %109, %112 : vector<16x16xf32>
    %114 = math.exp %113 : vector<16x16xf32>
    %cst_43 = arith.constant dense<0.000000e+00> : vector<16xf32>
    %115 = vector.multi_reduction <add>, %114, %cst_43 [1] : vector<16x16xf32> to vector<16xf32>
    %116 = vector.shape_cast %115 : vector<16xf32> to vector<16x1xf32>
    %117 = tpu.reciprocal %116 {approx = true} : vector<16x1xf32> -> vector<16x1xf32>
    %118 = vector.broadcast %117 : vector<16x1xf32> to vector<16x16xf32>
    %119 = arith.mulf %114, %118 : vector<16x16xf32>
    %120 = arith.addf %119, %3 : vector<16x16xf32>
    %cst_44 = arith.constant dense<0.000000e+00> : vector<16x8xf32>
    %121 = tpu.matmul %120, %106, %cst_44 {dimension_numbers = #tpu.dot_dimension_numbers<[1], [0], [0], [1], [0, 0, 1, 1], [], []>} : vector<16x16xf32>, vector<16x8xf32>, vector<16x8xf32> -> vector<16x8xf32>
    %c0_45 = arith.constant 0 : index
    %c40 = arith.constant 40 : index
    %122 = vector.load %arg8[%c0_45, %c40] : memref<16x48xf32, #tpu.memory_space<vmem>>, vector<16x8xf32>
    tpu.vector_store %arg8[%c0_45, %c40], %121 {strides = array<i32>} : memref<16x48xf32, #tpu.memory_space<vmem>>, vector<16x8xf32>,
    %c0_46 = arith.constant 0 : index
    %c0_47 = arith.constant 0 : index
    %123 = vector.load %arg8[%c0_46, %c0_47] : memref<16x48xf32, #tpu.memory_space<vmem>>, vector<16x48xf32>
    %c0_48 = arith.constant 0 : index
    %c0_49 = arith.constant 0 : index
    %124 = vector.load %arg5[%c0_48, %c0_49] : memref<48x48xf32, #tpu.memory_space<vmem>>, vector<48x48xf32>
    %cst_50 = arith.constant dense<0.000000e+00> : vector<16x48xf32>
    %125 = tpu.matmul %123, %124, %cst_50 {dimension_numbers = #tpu.dot_dimension_numbers<[1], [0], [0], [1], [0, 0, 1, 1], [], []>} : vector<16x48xf32>, vector<48x48xf32>, vector<16x48xf32> -> vector<16x48xf32>
    %c0_51 = arith.constant 0 : index
    %c0_52 = arith.constant 0 : index
    %126 = vector.load %arg6[%c0_51, %c0_52] : memref<1x48xf32, #tpu.memory_space<vmem>>, vector<1x48xf32>
    %127 = vector.broadcast %126 : vector<1x48xf32> to vector<16x48xf32>
    %128 = arith.addf %125, %127 : vector<16x48xf32>
    %c0_53 = arith.constant 0 : index
    %c0_54 = arith.constant 0 : index
    %c0_55 = arith.constant 0 : index
    %129 = vector.load %arg7[%c0_53, %c0_54, %c0_55] : memref<1x16x48xf32, #tpu.memory_space<vmem>>, vector<1x16x48xf32>
    %130 = vector.shape_cast %129 : vector<1x16x48xf32> to vector<16x48xf32>
    %131 = vector.shape_cast %128 : vector<16x48xf32> to vector<1x16x48xf32>
    tpu.vector_store %arg7[%c0_53, %c0_54, %c0_55], %131 {strides = array<i32>} : memref<1x16x48xf32, #tpu.memory_space<vmem>>, vector<1x16x48xf32>,
    return
  }
  func.func @transform_0(%arg0: i32) -> (i32, i32, i32) {
    %c0_i32 = arith.constant 0 : i32
    %c0_i32_0 = arith.constant 0 : i32
    %c0_i32_1 = arith.constant 0 : i32
    return %arg0, %c0_i32, %c0_i32_0 : i32, i32, i32
  }
  func.func @transform_1(%arg0: i32) -> (i32, i32, i32) {
    %c0_i32 = arith.constant 0 : i32
    %c0_i32_0 = arith.constant 0 : i32
    %c0_i32_1 = arith.constant 0 : i32
    return %arg0, %c0_i32, %c0_i32_0 : i32, i32, i32
  }
  func.func @transform_2(%arg0: i32) -> (i32, i32) {
    %c0_i32 = arith.constant 0 : i32
    %c0_i32_0 = arith.constant 0 : i32
    %c0_i32_1 = arith.constant 0 : i32
    return %c0_i32, %c0_i32_0 : i32, i32
  }
  func.func @transform_3(%arg0: i32) -> (i32, i32) {
    %c0_i32 = arith.constant 0 : i32
    %c0_i32_0 = arith.constant 0 : i32
    %c0_i32_1 = arith.constant 0 : i32
    return %c0_i32, %c0_i32_0 : i32, i32
  }
  func.func @transform_4(%arg0: i32) -> (i32, i32) {
    %c0_i32 = arith.constant 0 : i32
    %c0_i32_0 = arith.constant 0 : i32
    %c0_i32_1 = arith.constant 0 : i32
    return %c0_i32, %c0_i32_0 : i32, i32
  }
  func.func @transform_5(%arg0: i32) -> (i32, i32) {
    %c0_i32 = arith.constant 0 : i32
    %c0_i32_0 = arith.constant 0 : i32
    %c0_i32_1 = arith.constant 0 : i32
    return %c0_i32, %c0_i32_0 : i32, i32
  }
  func.func @transform_6(%arg0: i32) -> (i32, i32, i32) {
    %c0_i32 = arith.constant 0 : i32
    %c0_i32_0 = arith.constant 0 : i32
    %c0_i32_1 = arith.constant 0 : i32
    return %arg0, %c0_i32, %c0_i32_0 : i32, i32, i32
  }
}

</mosaic_0001>

<bundles_post_ra>
// kernel: tpu_custom_call.1
= control target key start
LH: loop header
LB: loop body
LE: loop exit
PB: predicated region body
PF: predicated region fallthrough
CT: control target
= control target key end

     0   :  { %s2166_s0 = inlined_call_operand.hbm [shape: f32[2,16,48], index: 0, kind: input, shape index: {}]   ;;  %s2167_s1 = inlined_call_operand.hbm [shape: f32[2,16,16], index: 1, kind: input, shape index: {}]   ;;  %s2168_s2 = inlined_call_operand.hbm [shape: f32[48,144], index: 2, kind: input, shape index: {}]   ;;  %s2169_s3 = inlined_call_operand.vmem [shape: f32[1,144], index: 3, kind: input, shape index: {}]   ;;  %s2170_s4 = inlined_call_operand.hbm [shape: f32[48,48], index: 4, kind: input, shape index: {}]   ;;  %s2171_s5 = inlined_call_operand.vmem [shape: f32[1,48], index: 5, kind: input, shape index: {}]   ;;  %s2172_s6 = inlined_call_operand.hbm [shape: f32[2,16,48], index: 6, kind: output, shape index: {}]  }
   0x1   :  { %2178 = sst [smem:[#allocation19_spill]] %s2166_s0 }
   0x2   :  { %2179 = sst [smem:[#allocation20_spill]] %s2168_s2 }
   0x3   :  { %2180 = sst [smem:[#allocation21_spill]] %s2170_s4 }
   0x4   :  { %11 = vsyncpa [#allocation4], 0 }
   0x5   :  { %13 = vsyncpa [#allocation4 + $0x1], 0 }
   0x6   :  { %14 = vsyncpa [#allocation7], 0 }
   0x7   :  { %16 = vsyncpa [#allocation7 + $0x1], 0 }
   0x8   :  { %17 = vsyncpa [#allocation10], 0 }
   0x9   :  { %18 = vsyncpa [#allocation5], 0 }
   0xa   :  { %20 = vsyncpa [#allocation5 + $0x1], 0  ;;  %s1741_s21 = smov 0   ;;  %s1743_s22 = smov 0  }
   0xb   :  { %s1745_s23 = smov 0   ;;  %s1747_s24 = smov 0  }
   0xc LB: > { %2181 = sst [smem:[#allocation17_spill]] %s1678_s23  ;;  %s1762_s25 = sadd.s32 4294967295, %s1682_s24   ;;  %s1682_s24 = sphi %s1747_s24, %s2198_s24   ;;  %s1678_s23 = sphi %s1745_s23, %s2195_s23   ;;  %s1674_s22 = sphi %s1743_s22, %s2197_s22   ;;  %s1670_s21 = sphi %s1741_s21, %s2196_s21  }
   0xd   : > { %s1249_s26 = sadd.s32 4294967294, %s1682_s24   ;;  %p46_p0 = scmp.ne.s32.totalorder %s1674_s22, %s1670_s21 }
   0xe   : > { %p47_p1 = scmp.eq.s32.totalorder %s1762_s25, 0  ;;  %p180_p2 = scmp.eq.s32.totalorder %s1762_s25, 1 }
   0xf   : > { %p186_p3 = scmp.eq.s32.totalorder %s1249_s26, 1  ;;  %p1250_p5 = scmp.ge.s32.totalorder %s1682_s24, 1 }
  0x10   : > { %p1771_p4 = por %p47_p1, %p46_p0  ;;  %p193_p7 = scmp.lt.s32.totalorder %s1682_s24, 3 }
  0x11   : > { %p1776_p6 = por %p186_p3, %p46_p0  ;;  %s2184_s2 = sld [smem:[#allocation20_spill]] }
  0x12   : > { %p1784_p8 = pnand %p1250_p5, %p193_p7  ;;  %s1684_s9 = smov [#allocation8]  }
  0x13   : > { %s206_s10 = sshll.u32 %s1684_s9, 4  ;;  %s2186_s4 = sld [smem:[#allocation21_spill]]  ;;  %s207_s10 = int_to_ptr.vmem [resolvable:$true] %s206_s10 }
  0x14   : > { %p1332_p9 = pneg %p1784_p8  ;;  %s1685_s14 = smov 256  }
  0x15   : > { %s1686_s15 = smov 16   ;;  %s1687_s16 = smov [#allocation9]  }
  0x16   : > { %p1333_p10 = pnand %p1332_p9, %p47_p1  ;;  %s223_s17 = sshll.u32 %s1687_s16, 4  ;;  %s224_s17 = int_to_ptr.vmem [resolvable:$true] %s223_s17 }
  0x17   : > { %s204_s7 = sshll.u32 %s2184_s2, 4  ;;  %s2173_s18 = smov 128   ;;  %s205_s7 = int_to_ptr.hbm [resolvable:$true] %s204_s7 }
  0x18   : > { %1335 = dma.hbm_to_vmem [thread:$0]  (!%p1333_p10), %s205_s7, 1536, %s207_s10, [#allocation7], %s1685_s14, %s1685_s14, %s1686_s15  }
  0x19   : > { %s221_s13 = sshll.u32 %s2186_s4, 4  ;;  %s2175_s19 = smov 8   ;;  %s222_s13 = int_to_ptr.hbm [resolvable:$true] %s221_s13 }
  0x1a   : > { %1338 = dma.hbm_to_vmem [thread:$0]  (!%p1333_p10), %s222_s13, 768, %s224_s17, [#allocation10], %s2173_s18, %s2173_s18, %s2175_s19  }
  0x1b   : > { %s1800_s20 = sadd.s32 1, %s1682_s24   ;;  %s33_s29 = sadd.s32 1, %s1678_s23 }
  0x1c   : > { %s30_s26 = ssub.s32 %s1682_s24, %s1800_s20  ;;  %p40_p13 = scmp.ne.s32.totalorder %s1678_s23, %s1674_s22 }
  0x1d   : > { %p31_p12 = scmp.eq.s32.totalorder %s30_s26, 0  ;;  %p41_p0 = scmp.eq.s32.totalorder %s1682_s24, 0 }
  0x1e   : > { %p1813_p5 = por %p180_p2, %p40_p13  ;;  %p1352_p7 = scmp.lt.s32.totalorder %s1682_s24, 2 }
  0x1f   : > { %s1809_s30 = scalar_select %p31_p12, %s1678_s23, %s33_s29  }
  0x20   : > { %p42_p3 = por %p41_p0, %p40_p13  ;;  %s240_s9 = sand.u32 1, %s1678_s23  }
  0x21   : > { %2187 = sst [smem:[#allocation18_spill]] %s1809_s30  ;;  %s1819_s10 = sshll.u32 %s240_s9, 4 }
  0x22   : > { %s1313_s11 = sshll.u32 %s1682_s24, 4  ;;  %s2189_s0 = sld [smem:[#allocation19_spill]] }
  0x23   : > { %s244_s15 = scalar_lea.vmem [#allocation3], %s1819_s10  ;;  %p1826_p9 = pnand %p1352_p7, %p42_p3 }
  0x24   : > { %s252_s16 = sshll.u32 %s244_s15, 4  ;;  %s271_s19 = scalar_lea.hbm %s2167_s1, %s1313_s11  ;;  %s253_s16 = int_to_ptr.vmem [resolvable:$true] %s252_s16 }
  0x25   : > { %s272_s2 = sshll.u32 %s271_s19, 4  ;;  %s241_s4 = scalar_lea.sflag [#allocation4], %s240_s9  ;;  %s273_s2 = int_to_ptr.hbm [resolvable:$true] %s272_s2 }
  0x26   : > { %p1548_p10 = pneg %p1826_p9 }
  0x28   : > { %s249_s14 = scalar_lea.hbm %s2189_s0, %s1313_s11  ;;  %s1551_s15 = scalar_lea.hbm %s2189_s0, 32 }
  0x29   : > { %s250_s17 = sshll.u32 %s249_s14, 4  ;;  %s251_s17 = int_to_ptr.hbm [resolvable:$true] %s250_s17 }
  0x2a   : > { %s1544_s30 = sshra.s32 %s251_s17, 4  ;;  %s1545_s30 = int_to_ptr.hbm [resolvable:$true] %s1544_s30 }
  0x2b   : > { %s1546_s12 = scalar_lea.hbm %s1545_s30, 16  ;;  %p1552_p0 = scmp.lt.s32.totalorder %s1545_s30, %s2189_s0 }
  0x2c   : > { %p1547_p2 = scmp.ne.s32.totalorder %s1545_s30, %s1546_s12  ;;  %p1553_p3 = scmp.lt.s32.totalorder %s1551_s15, %s1546_s12 }
  0x2e   : > { %p1549_p12 = pnand %p1548_p10, %p1547_p2  ;;  %p1554_p7 = por %p1553_p3, %p1552_p0 }
  0x30   : > { %p1550_p13 = pneg %p1549_p12 }
  0x32   : > { %p1555_p11 = pnand %p1554_p7, %p1550_p13 }
  0x34   : > { %1558 = shalt.err (!%p1555_p11)
}
  0x35   : > { %s2191_s19 = smov 8   ;;  %s2192_s9 = smov 128  }
  0x36   : > { %1342 = dma.hbm_to_vmem [thread:$0]  (!%p1826_p9), %s251_s17, 256, %s253_s16, %s241_s4, %s2192_s9, %s2192_s9, %s2191_s19  }
  0x37   : > { %s266_s11 = scalar_lea.vmem [#allocation6], %s1819_s10  ;;  %s262_s14 = sand.u32 1, %s1682_s24  }
  0x38   : > { %s274_s13 = sshll.u32 %s266_s11, 4  ;;  %s263_s18 = scalar_lea.sflag [#allocation7], %s262_s14  ;;  %s275_s13 = int_to_ptr.vmem [resolvable:$true] %s274_s13 }
  0x39   : > { %s1574_s30 = sshra.s32 %s273_s2, 4  ;;  %s1581_s0 = scalar_lea.hbm %s2167_s1, 32  ;;  %s1575_s30 = int_to_ptr.hbm [resolvable:$true] %s1574_s30 }
  0x3a   : > { %s1576_s12 = scalar_lea.hbm %s1575_s30, 16  ;;  %p1582_p13 = scmp.lt.s32.totalorder %s1575_s30, %s2167_s1 }
  0x3b   : > { %p1577_p2 = scmp.ne.s32.totalorder %s1575_s30, %s1576_s12  ;;  %p1583_p0 = scmp.lt.s32.totalorder %s1581_s0, %s1576_s12 }
  0x3d   : > { %p1579_p11 = pnand %p1577_p2, %p1548_p10  ;;  %p1584_p3 = por %p1583_p0, %p1582_p13 }
  0x3f   : > { %p1580_p12 = pneg %p1579_p11 }
  0x41   : > { %p1585_p7 = pnand %p1584_p3, %p1580_p12 }
  0x43   : > { %1588 = shalt.err (!%p1585_p7)
}
  0x44   : > { %1345 = dma.hbm_to_vmem [thread:$0]  (!%p1826_p9), %s273_s2, 256, %s275_s13, %s263_s18, %s2192_s9, %s2192_s9, %s2191_s19  }
  0x45   : > { %286 = sbr.rel (%p1784_p8) target bundleno = 1686 (0x696), region = 44  ;;  %s1868_s10 = sand.u32 (!%p1784_p8), 1, %s1674_s22  }
  0x46   : > { %s1871_s23 = sshll.u32 (!%p1784_p8), %s1868_s10, 4  ;;  %s289_s0 = scalar_lea.sflag (!%p1784_p8), [#allocation4], %s1868_s10 }
  0x47   : > { %s292_s16 = scalar_lea.vmem (!%p1784_p8), [#allocation3], %s1871_s23 }
  0x4a   : > { %1649 = dma.done.wait (%p1771_p4), %s289_s0, 256  }
  0x4b   : > { %1651 = vsyncadd (%p1771_p4), %s289_s0, 4294967040  ;;  %s298_s2 = sand.u32 1, %s1762_s25   ;;  %s302_s17 = scalar_lea.vmem [#allocation6], %s1871_s23 }
  0x4c   : > { %s299_s8 = scalar_lea.sflag [#allocation7], %s298_s2 }
  0x4d   : > { %1653 = dma.done.wait (%p1771_p4), %s299_s8, 256  }
  0x4e   : > { %1655 = vsyncadd (%p1771_p4), %s299_s8, 4294967040 }
  0x4f   : > { %1657 = dma.done.wait (%p47_p1), [#allocation7], 1536  }
  0x50   : > { %1659 = vsyncadd (%p47_p1), [#allocation7], 4294965760 }
  0x51   : > { %1661 = dma.done.wait (%p47_p1), [#allocation10], 768  }
  0x52   : > { %1663 = vsyncadd (%p47_p1), [#allocation10], 4294966528  ;;  %v361_v0 = vld [vmem:[#allocation8 + $0x50] sm:$0xff]  ;;  %v359_v1 = vld [vmem:[#allocation8 + $0x40] sm:$0xff]  ;;  %vm369_vm0 = vcmask 392192   ;;  %s1690_s19 = smov 72  }
  0x53   : > { %386 = vmatpush.msra.mxu0 %v361_v0  ;;  %v357_v2 = vld [vmem:[#allocation8 + $0x30] sm:$0xff]  ;;  %v355_v3 = vld [vmem:[#allocation8 + $0x20] sm:$0xff]  ;;  %v348_v7 = vld [vmem:[%s292_s16 + $0x8] sm:$0xff]  ;;  %s1691_s9 = smov 80   ;;  %s1692_s11 = smov 56   ;;  %vm428_vm1 = vcmask 64512  }
  0x54   : > { %v353_v4 = vld [vmem:[#allocation8 + $0x10] sm:$0xff]  ;;  %v351_v5 = vld [vmem:[#allocation8] sm:$0xff]  ;;  %s1693_s13 = smov 32   ;;  %s1694_s14 = smov 120   ;;  %v362_v16 = vld [vmem:[#allocation8 + $0x58] sm:$0xff]  ;;  %vm462_vm2 = vcmask 130048  }
  0x55   : > { %387 = vmatpush.msra.mxu0 %v359_v1  ;;  %v347_v6 = vld [vmem:[%s292_s16] sm:$0xff]  ;;  %s1695_s18 = smov 64   ;;  %s1696_s30 = smov 40   ;;  %v360_v17 = vld [vmem:[#allocation8 + $0x48] sm:$0xff]  ;;  %409 = vmatpush.msra.mxu1 %v362_v16  ;;  %v358_v19 = vld [vmem:[#allocation8 + $0x38] sm:$0xff]  ;;  %vm632_vm3 = vcmask 130112  }
  0x56   : > { %v1898_v8 = vld [vmem:[%s2169_s3] sm:$0x3]  ;;  %s1697_s12 = smov 88   ;;  %s1698_s15 = smov 48   ;;  %v356_v20 = vld [vmem:[#allocation8 + $0x28] sm:$0xff]  ;;  %v354_v21 = vld [vmem:[#allocation8 + $0x18] sm:$0xff] }
  0x57   : > { %388 = vmatpush.msra.mxu0 %v357_v2  ;;  %v365_v9 = vperm.slane %v1898_v8, 0  ;;  %s1699_s29 = smov 96   ;;  %410 = vmatpush.msra.mxu1 %v360_v17  ;;  %v352_v22 = vld [vmem:[#allocation8 + $0x8] sm:$0xff]  ;;  %s1700_s4 = smov 104   ;;  %v1969_v55 = vld [vmem:[%s302_s17] sm:$0xff]  ;;  %vm743_vm4 = vcmask 195712  }
  0x58   : > { %s1701_s0 = smov 112   ;;  %v1976_v61 = vld [vmem:[%s302_s17 + $0x8] sm:$0xff]  ;;  %s1702_s16 = smov 24   ;;  %vm854_vm5 = vcmask 261312   ;;  %vm959_vm6 = vcmask 326912   ;;  %vm1072_vm7 = vcmask 392512  }
  0x59   : > { %389 = vmatpush.msra.mxu0 %v355_v3  ;;  %411 = vmatpush.msra.mxu1 %v358_v19  ;;  %s1703_s2 = smov 16   ;;  %s1704_s8 = smov 8  }
  0x5a   : > { %s346_s26 = scalar_lea.vmem [#allocation11], %s1871_s23 }
  0x5b   : > { %390 = vmatpush.msra.mxu0 %v353_v4  ;;  %412 = vmatpush.msra.mxu1 %v356_v20 }
  0x5d   : > { %391 = vmatpush.msra.mxu0 %v351_v5  ;;  %413 = vmatpush.msra.mxu1 %v354_v21 }
  0x5e   : > { %1266 = vmatmul.msk.f32.vlgmr.msra.gmra.mxu0 %vm369_vm0, %v347_v6 }
  0x5f   : > { %414 = vmatpush.msra.mxu1 %v352_v22 }
  0x60   : > { %1268 = vmatmul.msk.f32.vlgmr.msra.gmra.mxu1 %vm369_vm0, %v347_v6 }
  0x66   : > { %1267 = vmatmul.msk.f32.gmra.mxu0 %vm369_vm0, %v348_v7 }
  0x68   : > { %1269 = vmatmul.msk.f32.gmra.mxu1 %vm369_vm0, %v348_v7 }
  0xdb   : > { %v393_v10 = vpop.f32.mrf.mxu0 }
  0xdc   : > { %v1901_v11 = vadd.f32 %v393_v10, %v365_v9 }
  0xdd   : > { %v2000_v10 = vpop.f32.mrf.mxu1 }
  0xde   : > { %528 = vrot.lane.b32.xlu2 %v1901_v11, %s1690_s19 }
  0xe3   : > { %v396_v12 = vpop.f32.mrf.mxu0 }
  0xe4   : > { %v1905_v13 = vadd.f32 %v396_v12, %v365_v9 }
  0xe5   : > { %v2003_v16 = vpop.f32.mrf.mxu1 }
  0xe6   : > { %426 = vrot.lane.b32.xlu0 %v1905_v13, %s1691_s9  ;;  %750 = vrot.lane.b32.xlu2 %v1901_v11, %s1692_s11  ;;  %v1912_v14 = vpack.i.bf16 %v1901_v11, %v1905_v13 }
  0xee   : > { %424 = vrot.lane.b32.xlu0 %v1901_v11, %s1691_s9 }
  0xf6   : > { %1411 = vrot.lane.b32.xlu0 %v1912_v14, %s1693_s13 }
  0xfe   : > { %524 = vrot.lane.b32.xlu0 %v1901_v11, %s1694_s14 }
 0x106   : > { %526 = vrot.lane.b32.xlu0 %v1905_v13, %s1694_s14 }
 0x10e   : > { %752 = vrot.lane.b32.xlu0 %v1905_v13, %s1692_s11 }
 0x116   : > { %641 = vrot.lane.b32.xlu0 %v1905_v13, %s1695_s18 }
 0x11e   : > { %968 = vrot.lane.b32.xlu0 %v1905_v13, %s1696_s30 }
 0x126   : > { %962 = vrot.lane.b32.xlu0 %v1901_v11, %s1697_s12 }
 0x12e   : > { %861 = vrot.lane.b32.xlu0 %v1901_v11, %s1698_s15 }
 0x136   : > { %859 = vrot.lane.b32.xlu0 %v1905_v13, %s1699_s29 }
 0x138   : > { %v529_v47 = vpop.permute.xlu2 %528 }
 0x140   : > { %v751_v49 = vpop.permute.xlu2 %750 }
 0x158   : > { %v427_v15 = vpop.permute.xlu0 %426 }
 0x159   : > { %1270 = vmatpush.xpose.msk.msra.mxu2 %vm428_vm1, %v427_v15 }
 0x160   : > { %v425_v18 = vpop.permute.xlu0 %424 }
 0x161   : > { %1271 = vmatpush.xpose.msk.msra.mxu2 %vm428_vm1, %v425_v18 }
 0x164   : > { %1272 = vmatmul.msk.f32.vlgmr.msra.gmra.mxu2 %vm428_vm1, %v1901_v11 }
 0x168   : > { %v1412_v23 = vpop.permute.xlu0 %1411 }
 0x169   : > { %v1413_v24 = vunpack.i.l.bf16 %v1412_v23  ;;  %v1414_v25 = vunpack.i.h.bf16 %v1412_v23 }
 0x16b   : > { %513 = vmatpush.msra.mxu3 %v1413_v24 }
 0x16c   : > { %1273 = vmatmul.msk.f32.gmra.mxu2 %vm428_vm1, %v1905_v13 }
 0x16d   : > { %514 = vmatpush.msra.mxu3 %v1414_v25 }
 0x170   : > { %v1938_v26 = vpop.permute.xlu0 %524 }
 0x178   : > { %v1941_v27 = vpop.permute.xlu0 %526 }
 0x180   : > { %v753_v28 = vpop.permute.xlu0 %752 }
 0x188   : > { %v642_v29 = vpop.permute.xlu0 %641 }
 0x189   : > { %1282 = vmatpush.xpose.msk.msrb.mxu0 %vm428_vm1, %v642_v29  ;;  %1316 = vmatpush.xpose.msk.msrb.mxu1 %vm428_vm1, %v642_v29 }
 0x190   : > { %v969_v52 = vpop.permute.xlu0 %968 }
 0x198   : > { %v963_v59 = vpop.permute.xlu0 %962 }
 0x1a0   : > { %v862_v2 = vpop.permute.xlu0 %861 }
 0x1a8   : > { %v860_v6 = vpop.permute.xlu0 %859 }
 0x1e7   : > { %v454_v30 = vpop.f32.mrf.mxu2 }
 0x1e8   : > { %v460_v31 = vmul.f32 0.35355338, %v454_v30 }
 0x1ea   : > { %v463_v32 = vsel %vm462_vm2, %v460_v31, -inf }
 0x1eb   : > { %464 = vmax.xlane.f32.xlu1 %v463_v32 }
 0x1ef   : > { %v457_v33 = vpop.f32.mrf.mxu2 }
 0x1f0   : > { %v461_v34 = vmul.f32 0.35355338, %v457_v33 }
 0x1f2   : > { %v466_v35 = vsel %vm462_vm2, %v461_v34, -inf }
 0x1f3   : > { %467 = vmax.xlane.f32.xlu1 %v466_v35 }
 0x20c   : > { %530 = vrot.lane.b32.xlu1 %v1905_v13, %s1690_s19  ;;  %s1315_s19 = sshll.u32 %s1762_s25, 4 }
 0x214   : > { %746 = vrot.lane.b32.xlu1 %v1901_v11, %s1700_s4 }
 0x21c   : > { %748 = vrot.lane.b32.xlu1 %v1905_v13, %s1700_s4 }
 0x224   : > { %966 = vrot.lane.b32.xlu1 %v1901_v11, %s1696_s30 }
 0x22c   : > { %863 = vrot.lane.b32.xlu1 %v1905_v13, %s1698_s15 }
 0x234   : > { %857 = vrot.lane.b32.xlu1 %v1901_v11, %s1699_s29  ;;  %s1624_s29 = scalar_lea.hbm %s2172_s6, 32 }
 0x25e   : > { %v465_v36 = vpop.xlane.xlu1 %464 }
 0x25f   : > { %v469_v37 = vsub.f32 %v460_v31, %v465_v36 }
 0x261   : > { %v471_v38 = vmul.f32 1.442695, %v469_v37 }
 0x263   : > { %1436 = vpow2.f32 %v471_v38 }
 0x266   : > { %v468_v39 = vpop.xlane.xlu1 %467 }
 0x267   : > { %v470_v40 = vsub.f32 %v461_v34, %v468_v39 }
 0x269   : > { %v1437_v41 = vpop.eup %1436  ;;  %v473_v42 = vmul.f32 1.442695, %v470_v40 }
 0x26a   : > { %v475_v43 = vsel %vm462_vm2, %v1437_v41, 0.0 }
 0x26b   : > { %1438 = vpow2.f32 %v473_v42  ;;  %476 = vadd.xlane.f32.xlu2 %v475_v43 }
 0x271   : > { %v1439_v44 = vpop.eup %1438 }
 0x272   : > { %v478_v45 = vsel %vm462_vm2, %v1439_v44, 0.0 }
 0x273   : > { %479 = vadd.xlane.f32.xlu2 %v478_v45 }
 0x27e   : > { %v531_v46 = vpop.permute.xlu1 %530 }
 0x27f   : > { %1276 = vmatpush.xpose.msk.msrb.mxu3 %vm428_vm1, %v531_v46 }
 0x283   : > { %1277 = vmatpush.xpose.msk.msrb.mxu3 %vm428_vm1, %v529_v47 }
 0x286   : > { %v747_v48 = vpop.permute.xlu1 %746 }
 0x28b   : > { %639 = vrot.lane.b32.xlu2 %v1901_v11, %s1695_s18 }
 0x28e   : > { %v749_v50 = vpop.permute.xlu1 %748 }
 0x293   : > { %635 = vrot.lane.b32.xlu2 %v1901_v11, %s1701_s0 }
 0x296   : > { %v967_v54 = vpop.permute.xlu1 %966 }
 0x29b   : > { %637 = vrot.lane.b32.xlu2 %v1905_v13, %s1701_s0 }
 0x29e   : > { %v864_v0 = vpop.permute.xlu1 %863 }
 0x2a3   : > { %964 = vrot.lane.b32.xlu2 %v1905_v13, %s1697_s12 }
 0x2a6   : > { %v858_v5 = vpop.permute.xlu1 %857 }
 0x2de   : > { %v477_v51 = vpop.xlane.xlu2 %476 }
 0x2df   : > { %1440 = vrcp.f32 %v477_v51 }
 0x2e5   : > { %v1441_v53 = vpop.eup %1440 }
 0x2e6   : > { %v480_v56 = vpop.xlane.xlu2 %479  ;;  %v483_v57 = vmul.f32 %v1441_v53, %v1437_v41 }
 0x2e7   : > { %1442 = vrcp.f32 %v480_v56 }
 0x2e8   : > { %v485_v58 = vadd.f32 %v483_v57, %v1969_v55 }
 0x2ea   : > { %1274 = vmatmul.msk.f32.vlgmr.msra.gmra.mxu3 %vm462_vm2, %v485_v58 }
 0x2eb   : > { %1288 = vmatpush.xpose.msk.msra.mxu3 %vm428_vm1, %v753_v28 }
 0x2ed   : > { %v1443_v60 = vpop.eup %1442 }
 0x2ee   : > { %v640_v62 = vpop.permute.xlu2 %639  ;;  %v484_v63 = vmul.f32 %v1443_v60, %v1439_v44 }
 0x2ef   : > { %1289 = vmatpush.xpose.msk.msra.mxu3 %vm428_vm1, %v751_v49  ;;  %1283 = vmatpush.xpose.msk.msrb.mxu0 %vm428_vm1, %v640_v62 }
 0x2f0   : > { %1317 = vmatpush.xpose.msk.msrb.mxu1 %vm428_vm1, %v640_v62  ;;  %v486_v1 = vadd.f32 %v484_v63, %v1976_v61 }
 0x2f2   : > { %1275 = vmatmul.msk.f32.gmra.mxu3 %vm462_vm2, %v486_v1 }
 0x2f3   : > { %1294 = vmatpush.xpose.msk.msra.mxu0 %vm428_vm1, %v864_v0 }
 0x2f6   : > { %v636_v3 = vpop.permute.xlu2 %635 }
 0x2f7   : > { %1295 = vmatpush.xpose.msk.msra.mxu0 %vm428_vm1, %v862_v2 }
 0x2f8   : > { %1284 = vmatmul.msk.f32.vlgmr.msrb.gmra.mxu0 %vm428_vm1, %v636_v3 }
 0x2fa   : > { %1278 = vmatmul.msk.f32.vlgmr.msrb.gmra.mxu3 %vm428_vm1, %v1938_v26 }
 0x2fb   : > { %1300 = vmatpush.xpose.msk.msrb.mxu3 %vm428_vm1, %v969_v52 }
 0x2fe   : > { %v638_v4 = vpop.permute.xlu2 %637 }
 0x2ff   : > { %1301 = vmatpush.xpose.msk.msrb.mxu3 %vm428_vm1, %v967_v54  ;;  %1285 = vmatmul.msk.f32.vlgmr.msrb.gmra.mxu1 %vm428_vm1, %v638_v4 }
 0x300   : > { %1296 = vmatmul.msk.f32.vlgmr.msra.gmra.mxu0 %vm428_vm1, %v858_v5 }
 0x302   : > { %1279 = vmatmul.msk.f32.gmra.mxu3 %vm428_vm1, %v1941_v27 }
 0x306   : > { %v965_v7 = vpop.permute.xlu2 %964 }
 0x308   : > { %1297 = vmatmul.msk.f32.gmra.mxu0 %vm428_vm1, %v860_v6 }
 0x30a   : > { %1290 = vmatmul.msk.f32.vlgmr.msra.gmra.mxu3 %vm428_vm1, %v747_v48 }
 0x312   : > { %1291 = vmatmul.msk.f32.gmra.mxu3 %vm428_vm1, %v749_v50 }
 0x31a   : > { %1302 = vmatmul.msk.f32.vlgmr.msrb.gmra.mxu3 %vm428_vm1, %v963_v59 }
 0x322   : > { %1303 = vmatmul.msk.f32.gmra.mxu3 %vm428_vm1, %v965_v7 }
 0x36d   : > { %v516_v9 = vpop.f32.mrf.mxu3 }
 0x36e   : > { %522 = vst.msk [vmem:[#allocation2] sm:$0xff] %vm428_vm1, %v516_v9 }
 0x375   : > { %v519_v11 = vpop.f32.mrf.mxu3  ;;  %v668_v12 = vpop.f32.mrf.mxu0 }
 0x376   : > { %523 = vst.msk [vmem:[#allocation2 + $0x8] sm:$0xff] %vm428_vm1, %v519_v11  ;;  %v674_v18 = vmul.f32 0.35355338, %v668_v12 }
 0x378   : > { %v676_v22 = vsel %vm462_vm2, %v674_v18, -inf }
 0x37c   : > { %v671_v24 = vpop.f32.mrf.mxu1 }
 0x37d   : > { %v557_v13 = vpop.f32.mrf.mxu3  ;;  %v890_v21 = vpop.f32.mrf.mxu0  ;;  %v675_v25 = vmul.f32 0.35355338, %v671_v24 }
 0x37e   : > { %v563_v15 = vmul.f32 0.35355338, %v557_v13  ;;  %v896_v36 = vmul.f32 0.35355338, %v890_v21 }
 0x37f   : > { %v679_v28 = vsel %vm462_vm2, %v675_v25, -inf }
 0x380   : > { %v565_v17 = vsel %vm462_vm2, %v563_v15, -inf  ;;  %v898_v37 = vsel %vm462_vm2, %v896_v36, -inf }
 0x381   : > { %566 = vmax.xlane.f32.xlu2 %v565_v17 }
 0x385   : > { %v560_v19 = vpop.f32.mrf.mxu3  ;;  %v893_v30 = vpop.f32.mrf.mxu0 }
 0x386   : > { %v2006_v20 = vmul.f32 0.35355338, %v560_v19  ;;  %v2013_v31 = vmul.f32 0.35355338, %v893_v30 }
 0x388   : > { %v568_v23 = vsel %vm462_vm2, %v2006_v20, -inf  ;;  %v901_v34 = vsel %vm462_vm2, %v2013_v31, -inf }
 0x389   : > { %677 = vmax.xlane.f32.xlu2 %v676_v22  ;;  %569 = vmax.xlane.f32.xlu1 %v568_v23 }
 0x38d   : > { %v779_v26 = vpop.f32.mrf.mxu3 }
 0x38e   : > { %v785_v27 = vmul.f32 0.35355338, %v779_v26 }
 0x390   : > { %v787_v29 = vsel %vm462_vm2, %v785_v27, -inf }
 0x391   : > { %680 = vmax.xlane.f32.xlu2 %v679_v28  ;;  %788 = vmax.xlane.f32.xlu0 %v787_v29 }
 0x395   : > { %v782_v32 = vpop.f32.mrf.mxu3 }
 0x396   : > { %v786_v33 = vmul.f32 0.35355338, %v782_v32 }
 0x398   : > { %v790_v35 = vsel %vm462_vm2, %v786_v33, -inf }
 0x399   : > { %902 = vmax.xlane.f32.xlu0 %v901_v34  ;;  %791 = vmax.xlane.f32.xlu1 %v790_v35 }
 0x39d   : > { %v995_v38 = vpop.f32.mrf.mxu3 }
 0x39e   : > { %v2021_v39 = vmul.f32 0.35355338, %v995_v38 }
 0x3a0   : > { %v1003_v40 = vsel %vm462_vm2, %v2021_v39, -inf }
 0x3a1   : > { %899 = vmax.xlane.f32.xlu1 %v898_v37 }
 0x3a5   : > { %v998_v58 = vpop.f32.mrf.mxu3 }
 0x3a6   : > { %v2035_v60 = vmul.f32 0.35355338, %v998_v58 }
 0x3a8   : > { %v1006_v1 = vsel %vm462_vm2, %v2035_v60, -inf }
 0x3ad   : > { %1416 = vrot.lane.b32.xlu0 %v1912_v14, %s1702_s16 }
 0x3d7   : > { %1004 = vmax.xlane.f32.xlu0 %v1003_v40 }
 0x3eb   : > { %1426 = vrot.lane.b32.xlu0 %v1912_v14, %s1703_s2 }
 0x3f4   : > { %v567_v41 = vpop.xlane.xlu2 %566 }
 0x3f5   : > { %v571_v42 = vsub.f32 %v563_v15, %v567_v41 }
 0x3f7   : > { %v573_v43 = vmul.f32 1.442695, %v571_v42 }
 0x3f9   : > { %1444 = vpow2.f32 %v573_v43 }
 0x3fc   : > { %v678_v44 = vpop.xlane.xlu2 %677  ;;  %v570_v49 = vpop.xlane.xlu1 %569 }
 0x3fd   : > { %v682_v45 = vsub.f32 %v674_v18, %v678_v44  ;;  %v572_v22 = vsub.f32 %v2006_v20, %v570_v49  ;;  %v366_v20 = vperm.slane %v1898_v8, 1 }
 0x3ff   : > { %v2027_v46 = vpop.eup %1444  ;;  %v684_v47 = vmul.f32 1.442695, %v682_v45  ;;  %v575_v23 = vmul.f32 1.442695, %v572_v22  ;;  %v420_v34 = vadd.f32 %v2003_v16, %v366_v20  ;;  %v417_v35 = vadd.f32 %v2000_v10, %v366_v20 }
 0x400   : > { %v577_v48 = vsel %vm462_vm2, %v2027_v46, 0.0 }
 0x401   : > { %1446 = vpow2.f32 %v684_v47  ;;  %578 = vadd.xlane.f32.xlu1 %v577_v48 }
 0x404   : > { %v681_v50 = vpop.xlane.xlu2 %680  ;;  %v789_v51 = vpop.xlane.xlu0 %788 }
 0x405   : > { %v683_v52 = vsub.f32 %v675_v25, %v681_v50  ;;  %v793_v56 = vsub.f32 %v785_v27, %v789_v51 }
 0x407   : > { %v2031_v53 = vpop.eup %1446  ;;  %v686_v54 = vmul.f32 1.442695, %v683_v52  ;;  %v795_v59 = vmul.f32 1.442695, %v793_v56 }
 0x408   : > { %v688_v57 = vsel %vm462_vm2, %v2031_v53, 0.0 }
 0x409   : > { %1448 = vpow2.f32 %v686_v54  ;;  %689 = vadd.xlane.f32.xlu2 %v688_v57 }
 0x40a   : > { %1450 = vpow2.f32 %v795_v59 }
 0x40c   : > { %v792_v62 = vpop.xlane.xlu1 %791  ;;  %v2045_v7 = vpop.xlane.xlu0 %902 }
 0x40d   : > { %v794_v0 = vsub.f32 %v786_v33, %v792_v62  ;;  %v905_v45 = vsub.f32 %v2013_v31, %v2045_v7 }
 0x40f   : > { %v2037_v63 = vpop.eup %1448  ;;  %v797_v3 = vmul.f32 1.442695, %v794_v0  ;;  %v908_v48 = vmul.f32 1.442695, %v905_v45  ;;  %v1078_v45 = vld [vmem:[#allocation9 + $0x8] sm:$0xff] }
 0x410   : > { %v691_v2 = vsel %vm462_vm2, %v2037_v63, 0.0  ;;  %v2043_v5 = vpop.eup %1450 }
 0x411   : > { %1007 = vmax.xlane.f32.xlu2 %v1006_v1  ;;  %692 = vadd.xlane.f32.xlu1 %v691_v2  ;;  %1452 = vpow2.f32 %v797_v3  ;;  %v799_v11 = vsel %vm462_vm2, %v2043_v5, 0.0 }
 0x414   : > { %v900_v4 = vpop.xlane.xlu1 %899 }
 0x415   : > { %v904_v6 = vsub.f32 %v896_v36, %v900_v4  ;;  %v1430_v36 = vpack.i.bf16 %v417_v35, %v420_v34 }
 0x417   : > { %v906_v9 = vmul.f32 1.442695, %v904_v6  ;;  %v2049_v12 = vpop.eup %1452 }
 0x418   : > { %v802_v17 = vsel %vm462_vm2, %v2049_v12, 0.0 }
 0x419   : > { %1454 = vpow2.f32 %v906_v9  ;;  %800 = vadd.xlane.f32.xlu1 %v799_v11 }
 0x41a   : > { %1456 = vpow2.f32 %v575_v23 }
 0x41f   : > { %v2051_v13 = vpop.eup %1454  ;;  %v1417_v15 = vpop.permute.xlu0 %1416 }
 0x420   : > { %v910_v18 = vsel %vm462_vm2, %v2051_v13, 0.0  ;;  %v1418_v19 = vunpack.i.l.bf16 %v1417_v15  ;;  %v1419_v21 = vunpack.i.h.bf16 %v1417_v15  ;;  %v2061_v27 = vpop.eup %1456 }
 0x421   : > { %803 = vadd.xlane.f32.xlu1 %v802_v17  ;;  %911 = vadd.xlane.f32.xlu0 %v910_v18  ;;  %v580_v28 = vsel %vm462_vm2, %v2061_v27, 0.0 }
 0x422   : > { %615 = vmatpush.msrb.mxu2 %v1418_v19 }
 0x424   : > { %616 = vmatpush.msrb.mxu2 %v1419_v21 }
 0x429   : > { %1421 = vrot.lane.b32.xlu2 %v1912_v14, %s1704_s8 }
 0x44a   : > { %v1005_v24 = vpop.xlane.xlu0 %1004 }
 0x44b   : > { %v1009_v25 = vsub.f32 %v2021_v39, %v1005_v24 }
 0x44d   : > { %v1011_v26 = vmul.f32 1.442695, %v1009_v25 }
 0x44f   : > { %1458 = vpow2.f32 %v1011_v26 }
 0x452   : > { %581 = vadd.xlane.f32.xlu2 %v580_v28 }
 0x455   : > { %v2065_v29 = vpop.eup %1458 }
 0x456   : > { %v1015_v14 = vsel %vm462_vm2, %v2065_v29, 0.0 }
 0x457   : > { %1016 = vadd.xlane.f32.xlu1 %v1015_v14 }
 0x45d   : > { %v1427_v30 = vpop.permute.xlu0 %1426 }
 0x45e   : > { %v1428_v32 = vunpack.i.l.bf16 %v1427_v30  ;;  %v1429_v33 = vunpack.i.h.bf16 %v1427_v30 }
 0x460   : > { %726 = vmatpush.msra.mxu1 %v1428_v32 }
 0x462   : > { %727 = vmatpush.msra.mxu1 %v1429_v33 }
 0x464   : > { %942 = vmatpush.msrb.mxu1 %v420_v34 }
 0x466   : > { %943 = vmatpush.msrb.mxu1 %v417_v35 }
 0x46a   : > { %1431 = vrot.lane.b32.xlu2 %v1430_v36, %s1694_s14  ;;  %s1131_s14 = sshll.u32 %s346_s26, 4  ;;  %s1132_s14 = int_to_ptr.vmem [resolvable:$true] %s1131_s14 }
 0x474   : > { %v579_v37 = vpop.xlane.xlu1 %578 }
 0x475   : > { %1460 = vrcp.f32 %v579_v37 }
 0x47b   : > { %v1461_v38 = vpop.eup %1460 }
 0x47c   : > { %v585_v39 = vmul.f32 %v1461_v38, %v2027_v46  ;;  %v690_v8 = vpop.xlane.xlu2 %689 }
 0x47d   : > { %1462 = vrcp.f32 %v690_v8 }
 0x47e   : > { %v587_v40 = vadd.f32 %v585_v39, %v1969_v55 }
 0x480   : > { %1280 = vmatmul.msk.f32.vlgmr.msrb.gmra.mxu2 %vm462_vm2, %v587_v40  ;;  %v1082_v40 = vld [vmem:[#allocation9 + $0x28] sm:$0xff] }
 0x481   : > { %1103 = vmatpush.msrb.mxu0 %v1082_v40 }
 0x483   : > { %v1463_v16 = vpop.eup %1462 }
 0x484   : > { %v696_v41 = vmul.f32 %v1463_v16, %v2031_v53  ;;  %v1008_v10 = vpop.xlane.xlu2 %1007  ;;  %v693_v42 = vpop.xlane.xlu1 %692  ;;  %v1081_v16 = vld [vmem:[#allocation9 + $0x20] sm:$0xff] }
 0x485   : > { %v1010_v43 = vsub.f32 %v2035_v60, %v1008_v10  ;;  %1464 = vrcp.f32 %v693_v42  ;;  %1104 = vmatpush.msrb.mxu0 %v1081_v16 }
 0x486   : > { %v698_v44 = vadd.f32 %v696_v41, %v1969_v55 }
 0x487   : > { %v1013_v46 = vmul.f32 1.442695, %v1010_v43  ;;  %v1080_v43 = vld [vmem:[#allocation9 + $0x18] sm:$0xff] }
 0x488   : > { %1286 = vmatmul.msk.f32.vlgmr.msra.gmra.mxu1 %vm462_vm2, %v698_v44  ;;  %v1079_v44 = vld [vmem:[#allocation9 + $0x10] sm:$0xff]  ;;  %1105 = vmatpush.msrb.mxu0 %v1080_v43 }
 0x489   : > { %1466 = vpow2.f32 %v1013_v46  ;;  %v1077_v46 = vld [vmem:[#allocation9] sm:$0xff] }
 0x48a   : > { %1468 = vpow2.f32 %v908_v48  ;;  %1106 = vmatpush.msrb.mxu0 %v1079_v44 }
 0x48b   : > { %v1465_v47 = vpop.eup %1464 }
 0x48c   : > { %v1422_v49 = vpop.permute.xlu2 %1421  ;;  %v697_v50 = vmul.f32 %v1465_v47, %v2037_v63  ;;  %v801_v63 = vpop.xlane.xlu1 %800  ;;  %1107 = vmatpush.msrb.mxu0 %v1078_v45 }
 0x48d   : > { %v1423_v51 = vunpack.i.l.bf16 %v1422_v49  ;;  %v1424_v54 = vunpack.i.h.bf16 %v1422_v49 }
 0x48e   : > { %v699_v52 = vadd.f32 %v697_v50, %v1976_v61  ;;  %1108 = vmatpush.msrb.mxu0 %v1077_v46 }
 0x48f   : > { %v1467_v53 = vpop.eup %1466  ;;  %837 = vmatpush.msra.mxu2 %v1423_v51 }
 0x490   : > { %1287 = vmatmul.msk.f32.gmra.mxu1 %vm462_vm2, %v699_v52  ;;  %v1018_v31 = vsel %vm462_vm2, %v1467_v53, 0.0  ;;  %v1469_v57 = vpop.eup %1468 }
 0x491   : > { %838 = vmatpush.msra.mxu2 %v1424_v54  ;;  %1019 = vadd.xlane.f32.xlu1 %v1018_v31  ;;  %v913_v58 = vsel %vm462_vm2, %v1469_v57, 0.0 }
 0x494   : > { %v912_v56 = vpop.xlane.xlu0 %911  ;;  %v804_v6 = vpop.xlane.xlu1 %803 }
 0x495   : > { %1470 = vrcp.f32 %v912_v56 }
 0x499   : > { %914 = vadd.xlane.f32.xlu1 %v913_v58 }
 0x49b   : > { %v1471_v59 = vpop.eup %1470 }
 0x49c   : > { %v918_v60 = vmul.f32 %v1471_v59, %v2051_v13 }
 0x49e   : > { %v920_v62 = vadd.f32 %v918_v60, %v1969_v55 }
 0x4a0   : > { %1298 = vmatmul.msk.f32.vlgmr.msrb.gmra.mxu1 %vm462_vm2, %v920_v62 }
 0x4c5   : > { %v582_v0 = vpop.xlane.xlu2 %581 }
 0x4c6   : > { %1472 = vrcp.f32 %v582_v0 }
 0x4c7   : > { %1474 = vrcp.f32 %v801_v63 }
 0x4c8   : > { %1476 = vrcp.f32 %v804_v6 }
 0x4ca   : > { %v1017_v17 = vpop.xlane.xlu1 %1016 }
 0x4cb   : > { %1478 = vrcp.f32 %v1017_v17 }
 0x4cc   : > { %v1473_v1 = vpop.eup %1472 }
 0x4cd   : > { %v1432_v2 = vpop.permute.xlu2 %1431  ;;  %v586_v3 = vmul.f32 %v1473_v1, %v2061_v27  ;;  %v1475_v9 = vpop.eup %1474 }
 0x4ce   : > { %v1433_v4 = vunpack.i.l.bf16 %v1432_v2  ;;  %v1434_v11 = vunpack.i.h.bf16 %v1432_v2  ;;  %v807_v13 = vmul.f32 %v1475_v9, %v2043_v5  ;;  %v1477_v18 = vpop.eup %1476 }
 0x4cf   : > { %v588_v7 = vadd.f32 %v586_v3, %v1976_v61  ;;  %v808_v19 = vmul.f32 %v1477_v18, %v2049_v12 }
 0x4d0   : > { %1055 = vmatpush.msrb.mxu2 %v1433_v4  ;;  %v809_v15 = vadd.f32 %v807_v13, %v1969_v55 }
 0x4d1   : > { %1281 = vmatmul.msk.f32.gmra.mxu2 %vm462_vm2, %v588_v7  ;;  %v810_v21 = vadd.f32 %v808_v19, %v1976_v61  ;;  %v1479_v22 = vpop.eup %1478 }
 0x4d2   : > { %1056 = vmatpush.msrb.mxu2 %v1434_v11  ;;  %v1023_v23 = vmul.f32 %v1479_v22, %v2065_v29 }
 0x4d4   : > { %v1025_v24 = vadd.f32 %v1023_v23, %v1969_v55 }
 0x4d9   : > { %1292 = vmatmul.msk.f32.vlgmr.msra.gmra.mxu2 %vm462_vm2, %v809_v15 }
 0x4e1   : > { %1293 = vmatmul.msk.f32.gmra.mxu2 %vm462_vm2, %v810_v21 }
 0x4e9   : > { %1304 = vmatmul.msk.f32.vlgmr.msrb.gmra.mxu2 %vm462_vm2, %v1025_v24 }
 0x503   : > { %v618_v32 = vpop.f32.mrf.mxu2 }
 0x504   : > { %v1020_v5 = vpop.xlane.xlu1 %1019 }
 0x505   : > { %1480 = vrcp.f32 %v1020_v5  ;;  %v729_v25 = vpop.f32.mrf.mxu1 }
 0x506   : > { %737 = vrot.lane.b32.xlu1 %v729_v25, %s1703_s2 }
 0x50b   : > { %v1481_v26 = vpop.eup %1480 }
 0x50c   : > { %v915_v27 = vpop.xlane.xlu1 %914  ;;  %v1024_v28 = vmul.f32 %v1481_v26, %v1467_v53  ;;  %v1435_v53 = vld [vmem:[%s2171_s5] ss:$0 sm:$0xff] }
 0x50d   : > { %1482 = vrcp.f32 %v915_v27  ;;  %v732_v12 = vpop.f32.mrf.mxu1 }
 0x50e   : > { %739 = vrot.lane.b32.xlu1 %v732_v12, %s1703_s2  ;;  %v1026_v14 = vadd.f32 %v1024_v28, %v1976_v61 }
 0x510   : > { %1305 = vmatmul.msk.f32.gmra.mxu2 %vm462_vm2, %v1026_v14 }
 0x513   : > { %v1483_v29 = vpop.eup %1482 }
 0x514   : > { %v919_v55 = vmul.f32 %v1483_v29, %v1469_v57 }
 0x516   : > { %v921_v20 = vadd.f32 %v919_v55, %v1976_v61 }
 0x518   : > { %1299 = vmatmul.msk.f32.gmra.mxu1 %vm462_vm2, %v921_v20 }
 0x51d   : > { %v945_v30 = vpop.f32.mrf.mxu1 }
 0x51e   : > { %953 = vrot.lane.b32.xlu2 %v945_v30, %s1693_s13 }
 0x526   : > { %626 = vrot.lane.b32.xlu2 %v618_v32, %s1704_s8 }
 0x554   : > { %v621_v33 = vpop.f32.mrf.mxu2 }
 0x55c   : > { %v840_v34 = vpop.f32.mrf.mxu2 }
 0x55d   : > { %848 = vrot.lane.b32.xlu2 %v840_v34, %s1702_s16 }
 0x564   : > { %v843_v35 = vpop.f32.mrf.mxu2 }
 0x565   : > { %628 = vrot.lane.b32.xlu2 %v621_v33, %s1704_s8 }
 0x56c   : > { %v1058_v36 = vpop.f32.mrf.mxu2 }
 0x56d   : > { %850 = vrot.lane.b32.xlu2 %v843_v35, %s1702_s16  ;;  %1066 = vrot.lane.b32.xlu0 %v1058_v36, %s1696_s30 }
 0x578   : > { %v954_v61 = vpop.permute.xlu2 %953  ;;  %v738_v38 = vpop.permute.xlu1 %737 }
 0x580   : > { %v627_v37 = vpop.permute.xlu2 %626  ;;  %v740_v42 = vpop.permute.xlu1 %739 }
 0x581   : > { %633 = vst.msk [vmem:[#allocation2] sm:$0xff] %vm632_vm3, %v627_v37 }
 0x582   : > { %744 = vst.msk [vmem:[#allocation2] sm:$0xff] %vm743_vm4, %v738_v38 }
 0x593   : > { %v1061_v39 = vpop.f32.mrf.mxu2 }
 0x594   : > { %1068 = vrot.lane.b32.xlu2 %v1061_v39, %s1696_s30  ;;  %s1119_s30 = scalar_lea.sflag [#allocation5], %s1868_s10 }
 0x595   : > { %v948_v8 = vpop.f32.mrf.mxu1 }
 0x596   : > { %955 = vrot.lane.b32.xlu1 %v948_v8, %s1693_s13  ;;  %s1130_s13 = scalar_lea.hbm %s2172_s6, %s1315_s19 }
 0x597   : > { %s1133_s18 = sshll.u32 %s1130_s13, 4  ;;  %s1134_s18 = int_to_ptr.hbm [resolvable:$true] %s1133_s18 }
 0x598   : > { %s1618_s12 = sshra.s32 %s1134_s18, 4  ;;  %s1619_s12 = int_to_ptr.hbm [resolvable:$true] %s1618_s12 }
 0x599   : > { %s1620_s23 = scalar_lea.hbm %s1619_s12, 16  ;;  %p1625_p9 = scmp.lt.s32.totalorder %s1619_s12, %s2172_s6 }
 0x59a   : > { %p1621_p1 = scmp.ne.s32.totalorder %s1619_s12, %s1620_s23  ;;  %p1626_p10 = scmp.lt.s32.totalorder %s1624_s29, %s1620_s23 }
 0x59c   : > { %p1622_p4 = pnand %p1621_p1, %p1813_p5  ;;  %p1627_p2 = por %p1626_p10, %p1625_p9 }
 0x59e   : > { %p1623_p8 = pneg %p1622_p4 }
 0x5a0   : > { %p1628_p11 = pnand %p1627_p2, %p1623_p8 }
 0x5b7   : > { %v849_v41 = vpop.permute.xlu2 %848 }
 0x5b8   : > { %855 = vst.msk [vmem:[#allocation2] sm:$0xff] %vm854_vm5, %v849_v41 }
 0x5b9   : > { %960 = vst.msk [vmem:[#allocation2] sm:$0xff] %vm959_vm6, %v954_v61 }
 0x5bf   : > { %v629_v10 = vpop.permute.xlu2 %628 }
 0x5c0   : > { %634 = vst.msk [vmem:[#allocation2 + $0x8] sm:$0xff] %vm632_vm3, %v629_v10 }
 0x5c1   : > { %745 = vst.msk [vmem:[#allocation2 + $0x8] sm:$0xff] %vm743_vm4, %v740_v42 }
 0x5c7   : > { %v851_v47 = vpop.permute.xlu2 %850 }
 0x5c8   : > { %856 = vst.msk [vmem:[#allocation2 + $0x8] sm:$0xff] %vm854_vm5, %v851_v47 }
 0x5df   : > { %v1067_v48 = vpop.permute.xlu0 %1066 }
 0x5e0   : > { %1073 = vst.msk [vmem:[#allocation2] sm:$0xff] %vm1072_vm7, %v1067_v48 }
 0x5e7   : > { %v1075_v49 = vld [vmem:[#allocation2] sm:$0xff] }
 0x5e8   : > { %1306 = vmatmul.msk.f32.vlgmr.msrb.gmra.mxu0 %vm369_vm0, %v1075_v49 }
 0x5ee   : > { %v1069_v51 = vpop.permute.xlu2 %1068 }
 0x608   : > { %v956_v50 = vpop.permute.xlu1 %955 }
 0x609   : > { %961 = vst.msk [vmem:[#allocation2 + $0x8] sm:$0xff] %vm959_vm6, %v956_v50 }
 0x60a   : > { %1074 = vst.msk [vmem:[#allocation2 + $0x8] sm:$0xff] %vm1072_vm7, %v1069_v51 }
 0x611   : > { %v1076_v52 = vld [vmem:[#allocation2 + $0x8] sm:$0xff] }
 0x612   : > { %1307 = vmatmul.msk.f32.gmra.mxu0 %vm369_vm0, %v1076_v52 }
 0x665   : > { %v1110_v54 = vpop.f32.mrf.mxu0 }
 0x666   : > { %v1111_v31 = vadd.f32 %v1435_v53, %v1110_v54 }
 0x668   : > { %1116 = vst.msk [vmem:[%s346_s26] sm:$0xff] %vm369_vm0, %v1111_v31 }
 0x68f   : > { %v1113_v56 = vpop.f32.mrf.mxu0 }
 0x690   : > { %v1114_v57 = vadd.f32 %v1435_v53, %v1113_v56 }
 0x692   : > { %1117 = vst.msk [vmem:[%s346_s26 + $0x8] sm:$0xff] %vm369_vm0, %v1114_v57 }
 0x693   : > { %1631 = shalt.err (!%p1628_p11)
}
 0x694   : > { %s1705_s10 = smov 128  }
 0x695   : > { %1330 = dma.vmem_to_hbm [thread:$0]  (%p1813_p5), %s1132_s14, 256, %s1134_s18, %s1119_s30, %s1705_s10, %s1705_s10, %s1704_s8  }
 0x696 PF: > { %s1148_s16 = sand.u32 1, %s1670_s21   ;;  %p2193_p12 = scmp.ge.s32.totalorder %s1682_s24, 2 }
 0x697   : > { %s1149_s2 = scalar_lea.sflag [#allocation5], %s1148_s16 }
 0x698   : > { %p1347_p13 = pnand %p2193_p12, %p1776_p6 }
 0x69a   : > { %p1348_p0 = pneg %p1347_p13 }
 0x69c   : > { %1665 = dma.done.wait (%p1348_p0), %s1149_s2, 256  }
 0x69d   : > { %1667 = vsyncadd (%p1348_p0), %s1149_s2, 4294967040  ;;  %s2194_s17 = sld [smem:[#allocation17_spill]]  ;;  %p23_p3 = scmp.ge.s32.totalorder %s1800_s20, 4  }
 0x69e   : > { %s2195_s23 = sld [smem:[#allocation18_spill]]  ;;  %s2196_s21 = smov %s1674_s22 }
 0x69f   : > { %s2198_s24 = smov %s1800_s20  ;;  %25 = sbr.rel (!%p23_p3) target bundleno = 12 (0xc), region = 110 }
 0x6a3   : > { %s2197_s22 = smov %s2194_s17 }
 0x6a4   :  { %1155 = vsyncpa [#allocation4], 1 }
 0x6a5   :  { %1157 = vsyncpa [#allocation4 + $0x1], 1 }
 0x6a6   :  { %1158 = vsyncpa [#allocation7], 1 }
 0x6a7   :  { %1160 = vsyncpa [#allocation7 + $0x1], 1 }
 0x6a8   :  { %1161 = vsyncpa [#allocation10], 1 }
 0x6a9   :  { %1162 = vsyncpa [#allocation5], 1 }
 0x6aa   :  { %1164 = vsyncpa [#allocation5 + $0x1], 1 }

</bundles_post_ra>
